<compile_context>
chip_gen: v7x
topology: tpu7x:2x2x1
jax: 0.10.0
libtpu: 0.0.40
codegen_flags: <defaults>
</compile_context>

<pallas_src>
import jax
import jax.numpy as jnp
from jax import lax
from jax.experimental import pallas as pl
from jax.experimental.pallas import tpu as pltpu

_LANE = 128
_MAX_BLOCK_ROWS = 2048   # rows per grid step (3 f32 streams x 2 bufs ~ 6 MiB)
_SUB_ROWS = 256          # in-kernel sub-chunk rows (bounds vreg live ranges)


def _cdiv(a, b):
    return -(-a // b)


def _round_up(x, m):
    return _cdiv(x, m) * m


def _make_kernel(block_rows, m_valid, has_weight):
    """Focal-loss kernel over one (block_rows, 128) tile of the body."""
    needs_row_mask = (m_valid % block_rows) != 0
    if block_rows > _SUB_ROWS and block_rows % _SUB_ROWS == 0:
        sub_rows = _SUB_ROWS
    else:
        sub_rows = block_rows
    num_sub = block_rows // sub_rows

    def kernel(*refs):
        if has_weight:
            pred_ref, gt_ref, w_ref, loss_ref, npos_ref = refs
        else:
            pred_ref, gt_ref, loss_ref, npos_ref = refs
            w_ref = None

        row0 = pl.program_id(0) * block_rows

        def tile_partials(pred, gt, w, first_row, masked):
            pred = pred.astype(jnp.float32)
            gt = gt.astype(jnp.float32)
            pos_mask = gt == 1.0
            # One transcendental per element (EUP is a single unit / TC).
            log_v = jnp.log(jnp.where(pos_mask, pred, 1.0 - pred))
            omp = 1.0 - pred
            pos_term = log_v * omp * omp                    # log(p)*(1-p)^2
            omg = 1.0 - gt
            omg2 = omg * omg
            neg_term = log_v * (pred * pred) * (omg2 * omg2)
            # Exact PyTorch semantics: gt == 1 -> pos, gt < 1 -> neg, gt > 1 -> 0.
            term = jnp.where(pos_mask, pos_term,
                             jnp.where(gt < 1.0, neg_term, 0.0))
            if w is not None:
                term = term * w.astype(jnp.float32)
            npos = jnp.where(pos_mask, 1.0, 0.0)
            if masked:
                # Only the last grid block ever reaches here (pl.when-gated);
                # select (not multiply) so garbage rows can't leak NaN/inf.
                rows = lax.broadcasted_iota(jnp.int32, pred.shape, 0) + first_row
                valid = rows < m_valid
                term = jnp.where(valid, term, 0.0)
                npos = jnp.where(valid, npos, 0.0)
            return (jnp.sum(term, axis=0, keepdims=True),
                    jnp.sum(npos, axis=0, keepdims=True))

        def run(masked):
            if num_sub == 1:
                l, p = tile_partials(
                    pred_ref[...], gt_ref[...],
                    None if w_ref is None else w_ref[...],
                    row0, masked)
            else:
                def body(s, carry):
                    l_acc, p_acc = carry
                    i = pl.multiple_of(s * sub_rows, sub_rows)
                    w_sub = None if w_ref is None else w_ref[pl.ds(i, sub_rows), :]
                    l, p = tile_partials(
                        pred_ref[pl.ds(i, sub_rows), :],
                        gt_ref[pl.ds(i, sub_rows), :],
                        w_sub, row0 + i, masked)
                    return l_acc + l, p_acc + p

                init = (jnp.zeros((1, _LANE), jnp.float32),
                        jnp.zeros((1, _LANE), jnp.float32))
                l, p = lax.fori_loop(0, num_sub, body, init, unroll=True)

            loss_ref[...] = l[None]
            npos_ref[...] = p[None]

        if needs_row_mask:
            last = pl.num_programs(0) - 1
            @pl.when(pl.program_id(0) == last)
            def _():
                run(True)
            @pl.when(pl.program_id(0) != last)
            def _():
                run(False)
        else:
            run(False)

    return kernel


def _loss_terms_jax(pred, gt, weight):
    """Pure-JAX focal terms for the <128-element tail (tiny)."""
    pred = pred.astype(jnp.float32)
    gt = gt.astype(jnp.float32)
    pos = gt == 1.0
    logv = jnp.log(jnp.where(pos, pred, 1.0 - pred))
    pos_t = logv * (1.0 - pred) ** 2
    neg_t = logv * pred * pred * (1.0 - gt) ** 4
    term = jnp.where(pos, pos_t, jnp.where(gt < 1.0, neg_t, 0.0))
    if weight is not None:
        term = term * weight.astype(jnp.float32)
    return jnp.sum(term), jnp.sum(pos.astype(jnp.float32))


@jax.jit
def focal_loss(pred, gt, weight):
    """Equivalent of FocalLoss().forward(pred, gt, weight). Returns scalar f32."""
    weight = jnp.asarray(weight)
    has_weight = weight.size > 1
    if has_weight and weight.shape != pred.shape:
        # TODO(synk): stream small per-channel weights via SMEM scalar prefetch
        # (or per-channel partial sums) instead of materializing a broadcast.
        weight = jnp.broadcast_to(weight, pred.shape)

    n = pred.size
    m_body = n // _LANE
    body_n = m_body * _LANE
    tail_n = n - body_n

    pred_flat = pred.reshape(-1)
    gt_flat = gt.reshape(-1)
    w_flat = weight.reshape(-1) if has_weight else None

    loss_sum = jnp.float32(0.0)
    num_pos = jnp.float32(0.0)

    if m_body > 0:
        # 128-aligned body only; when numel % 128 == 0 this reshape is a free
        # bitcast and no slicing / padding happens at all.
        def body_rows(flat):
            body = flat if tail_n == 0 else flat[:body_n]
            return body.reshape(m_body, _LANE)

        inputs = [body_rows(pred_flat), body_rows(gt_flat)]
        if has_weight:
            inputs.append(body_rows(w_flat))

        # Block sizing: >=2 blocks whenever there is enough work (so megacore
        # on v7x uses both TensorCores), blocks as large as possible to
        # amortize the ~0.35us per-grid-step overhead, rounded to the
        # sub-chunk granule so the in-kernel fori_loop divides evenly.
        if m_body < 16:
            block_rows = m_body
        else:
            granule = _SUB_ROWS if m_body >= 2 * _SUB_ROWS else 8
            nblk = max(2, 2 * _cdiv(m_body, 2 * _MAX_BLOCK_ROWS))
            block_rows = min(_MAX_BLOCK_ROWS,
                             _round_up(_cdiv(m_body, nblk), granule))
        num_blocks = _cdiv(m_body, block_rows)

        tile_spec = pl.BlockSpec((block_rows, _LANE), lambda i: (i, 0))
        part_shape = jax.ShapeDtypeStruct((num_blocks, 1, _LANE), jnp.float32)
        part_spec = pl.BlockSpec((1, 1, _LANE), lambda i: (i, 0, 0))

        in_bytes = sum(int(x.size) * x.dtype.itemsize for x in inputs)
        out_bytes = 2 * num_blocks * _LANE * 4
        cost = pl.CostEstimate(flops=14 * body_n,
                               transcendentals=body_n,
                               bytes_accessed=in_bytes + out_bytes)

        loss_parts, npos_parts = pl.pallas_call(
            _make_kernel(block_rows, m_body, has_weight),
            out_shape=(part_shape, part_shape),
            grid_spec=pltpu.PrefetchScalarGridSpec(
                num_scalar_prefetch=0,
                grid=(num_blocks,),
                in_specs=[tile_spec] * len(inputs),
                out_specs=[part_spec, part_spec],
            ),
            compiler_params=pltpu.CompilerParams(
                # Each block writes its own output slot -> fully parallel grid.
                dimension_semantics=("parallel",),
                vmem_limit_bytes=32 * 1024 * 1024,
            ),
            cost_estimate=cost,
        )(*inputs)

        loss_sum = loss_sum + jnp.sum(loss_parts)
        num_pos = num_pos + jnp.sum(npos_parts)

    if tail_n:
        t_loss, t_pos = _loss_terms_jax(
            pred_flat[body_n:], gt_flat[body_n:],
            w_flat[body_n:] if has_weight else None)
        loss_sum = loss_sum + t_loss
        num_pos = num_pos + t_pos

    if not has_weight:
        # Scalar weight: loss is linear in it, fold at the end (no HBM stream).
        loss_sum = loss_sum * weight.reshape(()).astype(jnp.float32)

    # PyTorch: -neg if num_pos == 0 else -(pos+neg)/num_pos.  The pos sum is
    # identically 0 when there are no positives, so both cases collapse to:
    return -loss_sum / jnp.maximum(num_pos, 1.0)


def _reference_loss(pred, gt, weight):
    """Pure-JAX reference matching the PyTorch _neg_loss exactly."""
    pred = pred.astype(jnp.float32)
    gt = gt.astype(jnp.float32)
    weight = jnp.broadcast_to(jnp.asarray(weight), pred.shape).astype(jnp.float32)
    pos_inds = (gt == 1.0).astype(jnp.float32)
    neg_inds = (gt < 1.0).astype(jnp.float32)
    neg_weights = (1.0 - gt) ** 4
    pos_loss = jnp.sum(jnp.log(pred) * (1.0 - pred) ** 2 * pos_inds * weight)
    neg_loss = jnp.sum(
        jnp.log(1.0 - pred) * pred ** 2 * neg_weights * neg_inds * weight)
    num_pos = jnp.sum(pos_inds)
    return jnp.where(
        num_pos == 0,
        -neg_loss,
        -(pos_loss + neg_loss) / jnp.where(num_pos == 0, 1.0, num_pos),
    )


def _make_inputs(key, shape):
    k_pred, k_gt, k_w = jax.random.split(key, 3)
    pred = jax.nn.sigmoid(jax.random.normal(k_pred, shape, jnp.float32))
    pred = jnp.clip(pred, 1e-4, 1.0 - 1e-4)
    gt = jax.random.uniform(k_gt, shape, jnp.float32) * 0.9
    gt = gt.at[..., shape[-2] // 2, shape[-1] // 2].set(1.0)
    gt = gt.at[..., 1, 3].set(1.0)
    weight = jax.random.uniform(k_w, shape, jnp.float32, minval=0.5, maxval=1.5)
    return pred, gt, weight


def _check(name, got, want, tol=1e-3):
    got, want = float(got), float(want)
    assert jnp.isfinite(got), f"{name}: loss is not finite"
    assert abs(got - want) < tol * max(1.0, abs(want)), (
        f"mismatch ({name}): kernel={got} ref={want}")


if __name__ == "__main__":
    key = jax.random.PRNGKey(0)
    k1, k2, k3 = jax.random.split(key, 3)

    # 1) numel % 128 == 0, full elementwise weight + scalar weight fast path.
    pred, gt, weight = _make_inputs(k1, (2, 4, 16, 16))
    _check("full weight",
           jax.block_until_ready(focal_loss(pred, gt, weight)),
           _reference_loss(pred, gt, weight))
    w_scalar = jnp.asarray(1.3, jnp.float32)
    _check("scalar weight",
           jax.block_until_ready(focal_loss(pred, gt, w_scalar)),
           _reference_loss(pred, gt, w_scalar))

    # bf16 streaming path (inputs stay bf16 in HBM, promoted in-kernel).
    pred_b, gt_b = pred.astype(jnp.bfloat16), gt.astype(jnp.bfloat16)
    _check("bf16 inputs",
           jax.block_until_ready(focal_loss(pred_b, gt_b, w_scalar)),
           _reference_loss(pred_b, gt_b, w_scalar))

    # 2) m_body % block_rows != 0 -> exercises the pl.when row-masked last block.
    pred, gt, weight = _make_inputs(k2, (2, 4, 16, 17))
    _check("partial last block",
           jax.block_until_ready(focal_loss(pred, gt, weight)),
           _reference_loss(pred, gt, weight))

    # 3) numel % 128 != 0 -> exercises the pure-JAX tail combine (no padding copy).
    pred, gt, _ = _make_inputs(k3, (2, 3, 9, 11))
    _check("tail path",
           jax.block_until_ready(focal_loss(pred, gt, w_scalar)),
           _reference_loss(pred, gt, w_scalar))

    print("KERNEL_OK")
</pallas_src>

<mosaic_0001>
module attributes {stable_mosaic.version = 11 : i64} {
  func.func @kernel(%arg0: i32, %arg1: memref<8x128xf32, #tpu.memory_space<vmem>>, %arg2: memref<8x128xf32, #tpu.memory_space<vmem>>, %arg3: memref<8x128xf32, #tpu.memory_space<vmem>>, %arg4: memref<1x1x128xf32, #tpu.memory_space<vmem>>, %arg5: memref<1x1x128xf32, #tpu.memory_space<vmem>>) attributes {dimension_semantics = [#tpu.dimension_semantics<parallel>], iteration_bounds = array<i64: 2>, scalar_prefetch = 0 : i64, scratch_operands = 0 : i64, tpu.core_type = #tpu.core_type<tc>, window_params = [{transform_indices = @transform_0, window_bounds = array<i64: 8, 128>}, {transform_indices = @transform_1, window_bounds = array<i64: 8, 128>}, {transform_indices = @transform_2, window_bounds = array<i64: 8, 128>}, {transform_indices = @transform_3, window_bounds = array<i64: 1, 1, 128>}, {transform_indices = @transform_4, window_bounds = array<i64: 1, 1, 128>}]} {
    %c0 = arith.constant 0 : index
    %c0_0 = arith.constant 0 : index
    %0 = vector.load %arg1[%c0, %c0_0] : memref<8x128xf32, #tpu.memory_space<vmem>>, vector<8x128xf32>
    %c0_1 = arith.constant 0 : index
    %c0_2 = arith.constant 0 : index
    %1 = vector.load %arg2[%c0_1, %c0_2] : memref<8x128xf32, #tpu.memory_space<vmem>>, vector<8x128xf32>
    %c0_3 = arith.constant 0 : index
    %c0_4 = arith.constant 0 : index
    %2 = vector.load %arg3[%c0_3, %c0_4] : memref<8x128xf32, #tpu.memory_space<vmem>>, vector<8x128xf32>
    %cst = arith.constant 1.000000e+00 : f32
    %3 = vector.broadcast %cst : f32 to vector<8x128xf32>
    %4 = arith.cmpf oeq, %1, %3 : vector<8x128xf32>
    %cst_5 = arith.constant 1.000000e+00 : f32
    %5 = vector.broadcast %cst_5 : f32 to vector<8x128xf32>
    %6 = arith.subf %5, %0 : vector<8x128xf32>
    %7 = arith.select %4, %0, %6 : vector<8x128xi1>, vector<8x128xf32>
    %8 = math.log %7 : vector<8x128xf32>
    %cst_6 = arith.constant 1.000000e+00 : f32
    %9 = vector.broadcast %cst_6 : f32 to vector<8x128xf32>
    %10 = arith.subf %9, %0 : vector<8x128xf32>
    %11 = arith.mulf %8, %10 : vector<8x128xf32>
    %12 = arith.mulf %11, %10 : vector<8x128xf32>
    %cst_7 = arith.constant 1.000000e+00 : f32
    %13 = vector.broadcast %cst_7 : f32 to vector<8x128xf32>
    %14 = arith.subf %13, %1 : vector<8x128xf32>
    %15 = arith.mulf %14, %14 : vector<8x128xf32>
    %16 = arith.mulf %0, %0 : vector<8x128xf32>
    %17 = arith.mulf %8, %16 : vector<8x128xf32>
    %18 = arith.mulf %15, %15 : vector<8x128xf32>
    %19 = arith.mulf %17, %18 : vector<8x128xf32>
    %cst_8 = arith.constant 1.000000e+00 : f32
    %20 = vector.broadcast %cst_8 : f32 to vector<8x128xf32>
    %21 = arith.cmpf olt, %1, %20 : vector<8x128xf32>
    %cst_9 = arith.constant 0.000000e+00 : f32
    %22 = vector.broadcast %cst_9 : f32 to vector<8x128xf32>
    %23 = arith.select %21, %19, %22 : vector<8x128xi1>, vector<8x128xf32>
    %24 = arith.select %4, %12, %23 : vector<8x128xi1>, vector<8x128xf32>
    %25 = arith.mulf %24, %2 : vector<8x128xf32>
    %cst_10 = arith.constant 1.000000e+00 : f32
    %cst_11 = arith.constant 0.000000e+00 : f32
    %26 = vector.broadcast %cst_10 : f32 to vector<8x128xf32>
    %27 = vector.broadcast %cst_11 : f32 to vector<8x128xf32>
    %28 = arith.select %4, %26, %27 : vector<8x128xi1>, vector<8x128xf32>
    %cst_12 = arith.constant dense<0.000000e+00> : vector<128xf32>
    %29 = vector.multi_reduction <add>, %25, %cst_12 [0] : vector<8x128xf32> to vector<128xf32>
    %30 = vector.shape_cast %29 : vector<128xf32> to vector<1x128xf32>
    %cst_13 = arith.constant dense<0.000000e+00> : vector<128xf32>
    %31 = vector.multi_reduction <add>, %28, %cst_13 [0] : vector<8x128xf32> to vector<128xf32>
    %32 = vector.shape_cast %31 : vector<128xf32> to vector<1x128xf32>
    %33 = vector.shape_cast %30 : vector<1x128xf32> to vector<1x1x128xf32>
    %c0_14 = arith.constant 0 : index
    %c0_15 = arith.constant 0 : index
    %c0_16 = arith.constant 0 : index
    %34 = vector.load %arg4[%c0_14, %c0_15, %c0_16] : memref<1x1x128xf32, #tpu.memory_space<vmem>>, vector<1x1x128xf32>
    tpu.vector_store %arg4[%c0_14, %c0_15, %c0_16], %33 {strides = array<i32>} : memref<1x1x128xf32, #tpu.memory_space<vmem>>, vector<1x1x128xf32>,
    %35 = vector.shape_cast %32 : vector<1x128xf32> to vector<1x1x128xf32>
    %c0_17 = arith.constant 0 : index
    %c0_18 = arith.constant 0 : index
    %c0_19 = arith.constant 0 : index
    %36 = vector.load %arg5[%c0_17, %c0_18, %c0_19] : memref<1x1x128xf32, #tpu.memory_space<vmem>>, vector<1x1x128xf32>
    tpu.vector_store %arg5[%c0_17, %c0_18, %c0_19], %35 {strides = array<i32>} : memref<1x1x128xf32, #tpu.memory_space<vmem>>, vector<1x1x128xf32>,
    return
  }
  func.func @transform_0(%arg0: i32) -> (i32, i32) {
    %c0_i32 = arith.constant 0 : i32
    %c0_i32_0 = arith.constant 0 : i32
    return %arg0, %c0_i32 : i32, i32
  }
  func.func @transform_1(%arg0: i32) -> (i32, i32) {
    %c0_i32 = arith.constant 0 : i32
    %c0_i32_0 = arith.constant 0 : i32
    return %arg0, %c0_i32 : i32, i32
  }
  func.func @transform_2(%arg0: i32) -> (i32, i32) {
    %c0_i32 = arith.constant 0 : i32
    %c0_i32_0 = arith.constant 0 : i32
    return %arg0, %c0_i32 : i32, i32
  }
  func.func @transform_3(%arg0: i32) -> (i32, i32, i32) {
    %c0_i32 = arith.constant 0 : i32
    %c0_i32_0 = arith.constant 0 : i32
    %c0_i32_1 = arith.constant 0 : i32
    return %arg0, %c0_i32, %c0_i32_0 : i32, i32, i32
  }
  func.func @transform_4(%arg0: i32) -> (i32, i32, i32) {
    %c0_i32 = arith.constant 0 : i32
    %c0_i32_0 = arith.constant 0 : i32
    %c0_i32_1 = arith.constant 0 : i32
    return %arg0, %c0_i32, %c0_i32_0 : i32, i32, i32
  }
}

</mosaic_0001>

<bundles_post_ra>
// kernel: focal_loss.1
= control target key start
LH: loop header
LB: loop body
LE: loop exit
PB: predicated region body
PF: predicated region fallthrough
CT: control target
= control target key end

     0   :  { %s420_s15 = smov 0   ;;  %s459_s0 = inlined_call_operand.vmem [shape: f32[16,128], index: 0, kind: input, shape index: {}]   ;;  %s460_s1 = inlined_call_operand.vmem [shape: f32[16,128], index: 1, kind: input, shape index: {}]   ;;  %s461_s2 = inlined_call_operand.vmem [shape: f32[16,128], index: 2, kind: input, shape index: {}]   ;;  %s462_s3 = inlined_call_operand.vmem [shape: f32[2,1,128], index: 3, kind: output, shape index: {0}]   ;;  %s463_s4 = inlined_call_operand.vmem [shape: f32[2,1,128], index: 4, kind: output, shape index: {1}]  }
   0x1 LB: > { %s365_s16 = sadd.s32 4294967295, %s392_s15   ;;  %p369_p0 = scmp.ge.s32.totalorder %s392_s15, 1  ;;  %s392_s15 = sphi %s420_s15, %s15_s15  }
   0x2   : > { %p182_p1 = scmp.lt.s32.totalorder %s392_s15, 3 }
   0x4   : > { %p183_p2 = pnand %p369_p0, %p182_p1 }
   0x5   : > { %p216_p3 = scmp.lt.s32.totalorder (!%p183_p2), %s365_s16, 1  ;;  %v394_v3 = vmov (!%p183_p2), 0.0  }
   0x6   : > { %186 = sbr.rel (%p183_p2) target bundleno = 54 (0x36), region = 32 }
   0xd   : > { %s465_s16 = smov (!%p216_p3, %s365_s16), 1 }
   0xe   : > { %s431_s17 = sshll.u32 %s465_s16, 3  ;;  %s233_s26 = scalar_lea.vmem %s463_s4, %s465_s16 }
   0xf   : > { %s219_s20 = scalar_lea.vmem %s459_s0, %s431_s17  ;;  %s223_s23 = scalar_lea.vmem %s460_s1, %s431_s17 }
  0x10   : > { %v234_v0 = vld [vmem:[%s219_s20] sm:$0xff]  ;;  %s227_s29 = scalar_lea.vmem %s461_s2, %s431_s17  ;;  %s230_s6 = scalar_lea.vmem %s462_s3, %s465_s16 }
  0x11   : > { %v235_v1 = vld [vmem:[%s223_s23] sm:$0xff]  ;;  %v238_v2 = vsub.f32 1.0, %v234_v0  ;;  %v246_v13 = vmul.f32 %v234_v0, %v234_v0 }
  0x12   : > { %vm237_vm0 = vcmp.eq.f32.partialorder %v235_v1, 1.0  ;;  %v244_v8 = vsub.f32 1.0, %v235_v1  ;;  %vm250_vm1 = vcmp.lt.f32.partialorder %v235_v1, 1.0  ;;  %v236_v22 = vld [vmem:[%s227_s29] sm:$0xff] }
  0x13   : > { %v254_v4 = vsel %vm237_vm0, 1.0, %v394_v3  ;;  %v239_v5 = vsel %vm237_vm0, %v234_v0, %v238_v2 }
  0x14   : > { %v261_v6 = vrot.slane %v254_v4, 4  ;;  %384 = vlog2.f32 %v239_v5  ;;  %v245_v11 = vmul.f32 %v244_v8, %v244_v8 }
  0x16   : > { %v262_v7 = vadd.f32 %v261_v6, %v254_v4  ;;  %v248_v17 = vmul.f32 %v245_v11, %v245_v11 }
  0x18   : > { %v263_v9 = vrot.slane %v262_v7, 2 }
  0x1a   : > { %v264_v10 = vadd.f32 %v263_v9, %v262_v7 }
  0x1c   : > { %v265_v12 = vrot.slane %v264_v10, 1 }
  0x1e   : > { %v266_v14 = vadd.f32 %v265_v12, %v264_v10  ;;  %v385_v15 = vpop.eup %384 }
  0x1f   : > { %v241_v16 = vmul.f32 0.6931472, %v385_v15 }
  0x20   : > { %268 = vst [vmem:[%s233_s26] sm:$0x1] %v266_v14 }
  0x21   : > { %v242_v18 = vmul.f32 %v241_v16, %v238_v2  ;;  %v247_v19 = vmul.f32 %v246_v13, %v241_v16 }
  0x23   : > { %v243_v20 = vmul.f32 %v242_v18, %v238_v2  ;;  %v249_v21 = vmul.f32 %v248_v17, %v247_v19 }
  0x25   : > { %v251_v23 = vsel %vm250_vm1, %v249_v21, 0.0 }
  0x26   : > { %v252_v24 = vsel %vm237_vm0, %v243_v20, %v251_v23 }
  0x27   : > { %v253_v25 = vmul.f32 %v252_v24, %v236_v22 }
  0x29   : > { %v255_v26 = vrot.slane %v253_v25, 4 }
  0x2b   : > { %v256_v27 = vadd.f32 %v255_v26, %v253_v25 }
  0x2d   : > { %v257_v28 = vrot.slane %v256_v27, 2 }
  0x2f   : > { %v258_v29 = vadd.f32 %v257_v28, %v256_v27 }
  0x31   : > { %v259_v30 = vrot.slane %v258_v29, 1 }
  0x33   : > { %v260_v31 = vadd.f32 %v259_v30, %v258_v29 }
  0x35   : > { %267 = vst [vmem:[%s230_s6] sm:$0x1] %v260_v31 }
  0x36 PF: > { %s15_s15 = sadd.s32 1, %s392_s15  }
  0x37   : > { %p12_p4 = scmp.ge.s32.totalorder %s15_s15, 4  }
  0x39   :  { %14 = sbr.rel (!%p12_p4) target bundleno = 1 (0x1), region = 80 }

</bundles_post_ra>
